<compile_context>
chip_gen: v7x
topology: tpu7x:2x2x1
jax: 0.10.0
libtpu: 0.0.40
codegen_flags: <defaults>
</compile_context>

<pallas_src>
import functools
import math

import jax
import jax.numpy as jnp
from jax.experimental import pallas as pl
from jax.experimental.pallas import tpu as pltpu


def _mlp_actor_kernel(x_ref, w1_ref, b1_ref, w2_ref, b2_ref, w3_ref, b3_ref, o_ref):
    """Transposed-dataflow MLP: the batch is the lane dimension throughout.

    x_ref : (bb, in_dim)       f32   obs tile
    w1_ref: (hidden, in_dim)   f32   (PyTorch [fan_out, fan_in] layout)
    b1_ref: (hidden, 1)        f32
    w2_ref: (hidden, hidden)   bf16
    b2_ref: (hidden, 1)        f32
    w3_ref: (out_pad, hidden)  bf16  (out_dim zero-padded to a multiple of 8 sublanes)
    b3_ref: (out_pad, 1)       f32
    o_ref : (out_pad, bb)      f32   transposed output tile (batch in lanes)
    """
    # Layer 1 in full f32 on the MXU: contraction dim = in_dim is tiny, so the f32
    # multi-pass cost is negligible and layer-1 keeps f32 accuracy.
    # Contract w1's fan_in (dim 1) against x's fan_in (dim 1) -> (hidden, bb).
    h = jax.lax.dot_general(
        w1_ref[...], x_ref[...],
        dimension_numbers=(((1,), (1,)), ((), ())),
        preferred_element_type=jnp.float32,
    )
    h = jnp.maximum(h + b1_ref[...], 0.0)            # bias bcast over lanes + ReLU (VPU)

    # Layer 2: bf16 MXU operands, f32 accumulate.
    h = jnp.dot(w2_ref[...], h.astype(jnp.bfloat16),
                preferred_element_type=jnp.float32)
    h = jnp.maximum(h + b2_ref[...], 0.0)

    # Layer 3 + sigmoid (EUP). Output tile (out_pad, bb) is lane-dense in batch.
    out = jnp.dot(w3_ref[...], h.astype(jnp.bfloat16),
                  preferred_element_type=jnp.float32)
    # NOTE: padded out_dim rows / batch lanes beyond B carry junk (e.g. 0.5 after the
    # sigmoid); they are masked on writeback / sliced off in the wrapper.
    o_ref[...] = jax.nn.sigmoid(out + b3_ref[...]).astype(o_ref.dtype)


def _round_up(x, m):
    return (x + m - 1) // m * m


@functools.partial(jax.jit, static_argnames=("block_b",))
def feedforward_actor(obs, params, *, block_b=1024):
    """Fused MLP actor forward pass.

    obs: [B, in_dim] float32
    params (PyTorch nn.Linear layout):
        w1 [hidden, in_dim], b1 [hidden], w2 [hidden, hidden], b2 [hidden],
        w3 [out_dim, hidden], b3 [out_dim]   (all float32)
    Returns: [B, out_dim] float32 == sigmoid(relu(relu(obs@w1.T+b1)@w2.T+b2)@w3.T+b3)
    """
    B, in_dim = obs.shape
    hidden = params["w2"].shape[0]
    out_dim = params["w3"].shape[0]
    out_pad = _round_up(out_dim, 8)                    # sublane-align the small out_dim

    obs = obs.astype(jnp.float32)                      # no wrapper bf16 pass over obs
    w1 = params["w1"].astype(jnp.float32)              # layer 1 stays f32
    b1 = params["b1"].reshape(hidden, 1).astype(jnp.float32)
    w2 = params["w2"].astype(jnp.bfloat16)
    b2 = params["b2"].reshape(hidden, 1).astype(jnp.float32)
    w3 = params["w3"].astype(jnp.bfloat16)
    b3 = params["b3"].reshape(out_dim, 1).astype(jnp.float32)
    if out_pad != out_dim:
        w3 = jnp.pad(w3, ((0, out_pad - out_dim), (0, 0)))
        b3 = jnp.pad(b3, ((0, out_pad - out_dim), (0, 0)))

    # ---- batch tiling (batch is the lane dim of the transposed output) ------------
    if B <= block_b:
        bb = B                                   # single grid step, no padding anywhere
    else:
        bb = _round_up(min(block_b, B), 128)     # lane-dim blocks must be 128-multiples
        if pl.cdiv(B, bb) < 4:
            # >= 4 steps => >= 2 steps per TensorCore on v7x, and keeps the BlockSpec
            # double buffer overlapping obs DMA / writeback with compute. Each step
            # still carries >= 128 rows, so this is also fine on single-TC v5e/v6e.
            bb = max(128, _round_up(pl.cdiv(B, 4), 128))
    grid_n = pl.cdiv(B, bb)

    def _nbytes(a):
        return a.size * a.dtype.itemsize

    bytes_accessed = (
        _nbytes(obs) + _nbytes(w1) + _nbytes(b1) + _nbytes(w2) + _nbytes(b2)
        + _nbytes(w3) + _nbytes(b3) + out_pad * B * 4
    )
    cost = pl.CostEstimate(
        flops=2 * B * (in_dim * hidden + hidden * hidden + hidden * out_dim),
        transcendentals=B * out_dim,             # sigmoid
        bytes_accessed=bytes_accessed,
    )

    out_t = pl.pallas_call(
        _mlp_actor_kernel,
        out_shape=jax.ShapeDtypeStruct((out_pad, B), jnp.float32),
        grid_spec=pl.GridSpec(
            grid=(grid_n,),
            in_specs=[
                pl.BlockSpec((bb, in_dim), lambda i: (i, 0)),        # obs tile (f32)
                # Resident weights/biases: constant index_map -> fetched once, stay in
                # VMEM across all grid steps (total ~70 KB, VMEM is a non-issue).
                pl.BlockSpec((hidden, in_dim), lambda i: (0, 0)),    # w1 (f32)
                pl.BlockSpec((hidden, 1), lambda i: (0, 0)),         # b1
                pl.BlockSpec((hidden, hidden), lambda i: (0, 0)),    # w2 (bf16)
                pl.BlockSpec((hidden, 1), lambda i: (0, 0)),         # b2
                pl.BlockSpec((out_pad, hidden), lambda i: (0, 0)),   # w3 (bf16)
                pl.BlockSpec((out_pad, 1), lambda i: (0, 0)),        # b3
            ],
            out_specs=pl.BlockSpec((out_pad, bb), lambda i: (0, i)),
        ),
        compiler_params=pltpu.CompilerParams(
            dimension_semantics=("parallel",),   # batch axis: megacore-shardable on v7x
        ),
        cost_estimate=cost,
    )(obs, w1, b1, w2, b2, w3, b3)

    # Tiny (out_dim, B) -> (B, out_dim) relayout; ~4*B*out_dim bytes total.
    return out_t[:out_dim, :].T


def init_params(key, in_dim, out_dim, hidden=128):
    """Deterministic init mimicking PyTorch nn.Linear default (U[-1/sqrt(fan_in), ...])."""
    keys = jax.random.split(key, 6)

    def linear(kw, kb, fan_in, fan_out):
        bound = 1.0 / math.sqrt(fan_in)
        w = jax.random.uniform(kw, (fan_out, fan_in), jnp.float32, -bound, bound)
        b = jax.random.uniform(kb, (fan_out,), jnp.float32, -bound, bound)
        return w, b

    w1, b1 = linear(keys[0], keys[1], in_dim, hidden)
    w2, b2 = linear(keys[2], keys[3], hidden, hidden)
    w3, b3 = linear(keys[4], keys[5], hidden, out_dim)
    return {"w1": w1, "b1": b1, "w2": w2, "b2": b2, "w3": w3, "b3": b3}


def reference_forward(obs, p):
    h1 = jnp.maximum(obs @ p["w1"].T + p["b1"], 0.0)
    h2 = jnp.maximum(h1 @ p["w2"].T + p["b2"], 0.0)
    return jax.nn.sigmoid(h2 @ p["w3"].T + p["b3"])


if __name__ == "__main__":
    key = jax.random.PRNGKey(0)
    k_obs, k_params, k_obs2, k_obs3 = jax.random.split(key, 4)

    B, in_dim, out_dim = 8, 16, 4
    obs = jax.random.normal(k_obs, (B, in_dim), dtype=jnp.float32)
    params = init_params(k_params, in_dim, out_dim)

    out = jax.block_until_ready(feedforward_actor(obs, params))
    ref = reference_forward(obs, params)
    assert out.shape == (B, out_dim)
    # Layers 2/3 use bf16 MXU operands with f32 accumulation -> loosened tolerance.
    assert jnp.allclose(out, ref, atol=2e-2, rtol=2e-2), "mismatch vs JAX reference"

    # Ragged batch: still a single grid step, no host-side pad needed.
    B2 = 300
    obs2 = jax.random.normal(k_obs2, (B2, in_dim), dtype=jnp.float32)
    out2 = jax.block_until_ready(feedforward_actor(obs2, params))
    ref2 = reference_forward(obs2, params)
    assert out2.shape == (B2, out_dim)
    assert jnp.allclose(out2, ref2, atol=2e-2, rtol=2e-2), "mismatch (ragged batch)"

    # Multi-step grid path: weights resident across steps, batch axis "parallel".
    B3 = 512
    obs3 = jax.random.normal(k_obs3, (B3, in_dim), dtype=jnp.float32)
    out3 = jax.block_until_ready(feedforward_actor(obs3, params, block_b=128))
    ref3 = reference_forward(obs3, params)
    assert out3.shape == (B3, out_dim)
    assert jnp.allclose(out3, ref3, atol=2e-2, rtol=2e-2), "mismatch (multi-step grid)"

    print("KERNEL_OK")
</pallas_src>

<mosaic_0001>
module attributes {stable_mosaic.version = 11 : i64} {
  func.func @_mlp_actor_kernel(%arg0: i32, %arg1: memref<8x16xf32, #tpu.memory_space<vmem>>, %arg2: memref<128x16xf32, #tpu.memory_space<vmem>>, %arg3: memref<128x1xf32, #tpu.memory_space<vmem>>, %arg4: memref<128x128xbf16, #tpu.memory_space<vmem>>, %arg5: memref<128x1xf32, #tpu.memory_space<vmem>>, %arg6: memref<8x128xbf16, #tpu.memory_space<vmem>>, %arg7: memref<8x1xf32, #tpu.memory_space<vmem>>, %arg8: memref<8x8xf32, #tpu.memory_space<vmem>>) attributes {dimension_semantics = [#tpu.dimension_semantics<parallel>], iteration_bounds = array<i64: 1>, scalar_prefetch = 0 : i64, scratch_operands = 0 : i64, tpu.core_type = #tpu.core_type<tc>, window_params = [{transform_indices = @transform_0, window_bounds = array<i64: 8, 16>}, {pipeline_mode = #tpu.pipeline_mode<synchronous>, transform_indices = @transform_1, window_bounds = array<i64: 128, 16>}, {pipeline_mode = #tpu.pipeline_mode<synchronous>, transform_indices = @transform_2, window_bounds = array<i64: 128, 1>}, {pipeline_mode = #tpu.pipeline_mode<synchronous>, transform_indices = @transform_3, window_bounds = array<i64: 128, 128>}, {pipeline_mode = #tpu.pipeline_mode<synchronous>, transform_indices = @transform_4, window_bounds = array<i64: 128, 1>}, {pipeline_mode = #tpu.pipeline_mode<synchronous>, transform_indices = @transform_5, window_bounds = array<i64: 8, 128>}, {pipeline_mode = #tpu.pipeline_mode<synchronous>, transform_indices = @transform_6, window_bounds = array<i64: 8, 1>}, {transform_indices = @transform_7, window_bounds = array<i64: 8, 8>}]} {
    %c0 = arith.constant 0 : index
    %c0_0 = arith.constant 0 : index
    %0 = vector.load %arg2[%c0, %c0_0] : memref<128x16xf32, #tpu.memory_space<vmem>>, vector<128x16xf32>
    %c0_1 = arith.constant 0 : index
    %c0_2 = arith.constant 0 : index
    %1 = vector.load %arg1[%c0_1, %c0_2] : memref<8x16xf32, #tpu.memory_space<vmem>>, vector<8x16xf32>
    %cst = arith.constant dense<0.000000e+00> : vector<128x8xf32>
    %2 = tpu.matmul %0, %1, %cst {dimension_numbers = #tpu.dot_dimension_numbers<[1], [1], [0], [0], [0, 0, 1, 0], [], []>} : vector<128x16xf32>, vector<8x16xf32>, vector<128x8xf32> -> vector<128x8xf32>
    %c0_3 = arith.constant 0 : index
    %c0_4 = arith.constant 0 : index
    %3 = vector.load %arg3[%c0_3, %c0_4] : memref<128x1xf32, #tpu.memory_space<vmem>>, vector<128x1xf32>
    %4 = vector.broadcast %3 : vector<128x1xf32> to vector<128x8xf32>
    %5 = arith.addf %2, %4 : vector<128x8xf32>
    %cst_5 = arith.constant 0.000000e+00 : f32
    %6 = vector.broadcast %cst_5 : f32 to vector<128x8xf32>
    %7 = arith.maximumf %5, %6 : vector<128x8xf32>
    %c0_6 = arith.constant 0 : index
    %c0_7 = arith.constant 0 : index
    %8 = vector.load %arg4[%c0_6, %c0_7] : memref<128x128xbf16, #tpu.memory_space<vmem>>, vector<128x128xbf16>
    %9 = arith.truncf %7 : vector<128x8xf32> to vector<128x8xbf16>
    %cst_8 = arith.constant dense<0.000000e+00> : vector<128x8xf32>
    %10 = tpu.matmul %8, %9, %cst_8 {dimension_numbers = #tpu.dot_dimension_numbers<[1], [0], [0], [1], [0, 0, 1, 1], [], []>} : vector<128x128xbf16>, vector<128x8xbf16>, vector<128x8xf32> -> vector<128x8xf32>
    %c0_9 = arith.constant 0 : index
    %c0_10 = arith.constant 0 : index
    %11 = vector.load %arg5[%c0_9, %c0_10] : memref<128x1xf32, #tpu.memory_space<vmem>>, vector<128x1xf32>
    %12 = vector.broadcast %11 : vector<128x1xf32> to vector<128x8xf32>
    %13 = arith.addf %10, %12 : vector<128x8xf32>
    %cst_11 = arith.constant 0.000000e+00 : f32
    %14 = vector.broadcast %cst_11 : f32 to vector<128x8xf32>
    %15 = arith.maximumf %13, %14 : vector<128x8xf32>
    %c0_12 = arith.constant 0 : index
    %c0_13 = arith.constant 0 : index
    %16 = vector.load %arg6[%c0_12, %c0_13] : memref<8x128xbf16, #tpu.memory_space<vmem>>, vector<8x128xbf16>
    %17 = arith.truncf %15 : vector<128x8xf32> to vector<128x8xbf16>
    %cst_14 = arith.constant dense<0.000000e+00> : vector<8x8xf32>
    %18 = tpu.matmul %16, %17, %cst_14 {dimension_numbers = #tpu.dot_dimension_numbers<[1], [0], [0], [1], [0, 0, 1, 1], [], []>} : vector<8x128xbf16>, vector<128x8xbf16>, vector<8x8xf32> -> vector<8x8xf32>
    %c0_15 = arith.constant 0 : index
    %c0_16 = arith.constant 0 : index
    %19 = vector.load %arg7[%c0_15, %c0_16] : memref<8x1xf32, #tpu.memory_space<vmem>>, vector<8x1xf32>
    %20 = vector.broadcast %19 : vector<8x1xf32> to vector<8x8xf32>
    %21 = arith.addf %18, %20 : vector<8x8xf32>
    %22 = arith.negf %21 : vector<8x8xf32>
    %23 = math.exp %22 : vector<8x8xf32>
    %cst_17 = arith.constant 1.000000e+00 : f32
    %24 = vector.broadcast %cst_17 : f32 to vector<8x8xf32>
    %25 = arith.addf %24, %23 : vector<8x8xf32>
    %26 = arith.divf %24, %25 : vector<8x8xf32>
    %c0_18 = arith.constant 0 : index
    %c0_19 = arith.constant 0 : index
    %27 = vector.load %arg8[%c0_18, %c0_19] : memref<8x8xf32, #tpu.memory_space<vmem>>, vector<8x8xf32>
    tpu.vector_store %arg8[%c0_18, %c0_19], %26 {strides = array<i32>} : memref<8x8xf32, #tpu.memory_space<vmem>>, vector<8x8xf32>,
    return
  }
  func.func @transform_0(%arg0: i32) -> (i32, i32) {
    %c0_i32 = arith.constant 0 : i32
    %c0_i32_0 = arith.constant 0 : i32
    return %arg0, %c0_i32 : i32, i32
  }
  func.func @transform_1(%arg0: i32) -> (i32, i32) {
    %c0_i32 = arith.constant 0 : i32
    %c0_i32_0 = arith.constant 0 : i32
    %c0_i32_1 = arith.constant 0 : i32
    return %c0_i32, %c0_i32_0 : i32, i32
  }
  func.func @transform_2(%arg0: i32) -> (i32, i32) {
    %c0_i32 = arith.constant 0 : i32
    %c0_i32_0 = arith.constant 0 : i32
    %c0_i32_1 = arith.constant 0 : i32
    return %c0_i32, %c0_i32_0 : i32, i32
  }
  func.func @transform_3(%arg0: i32) -> (i32, i32) {
    %c0_i32 = arith.constant 0 : i32
    %c0_i32_0 = arith.constant 0 : i32
    %c0_i32_1 = arith.constant 0 : i32
    return %c0_i32, %c0_i32_0 : i32, i32
  }
  func.func @transform_4(%arg0: i32) -> (i32, i32) {
    %c0_i32 = arith.constant 0 : i32
    %c0_i32_0 = arith.constant 0 : i32
    %c0_i32_1 = arith.constant 0 : i32
    return %c0_i32, %c0_i32_0 : i32, i32
  }
  func.func @transform_5(%arg0: i32) -> (i32, i32) {
    %c0_i32 = arith.constant 0 : i32
    %c0_i32_0 = arith.constant 0 : i32
    %c0_i32_1 = arith.constant 0 : i32
    return %c0_i32, %c0_i32_0 : i32, i32
  }
  func.func @transform_6(%arg0: i32) -> (i32, i32) {
    %c0_i32 = arith.constant 0 : i32
    %c0_i32_0 = arith.constant 0 : i32
    %c0_i32_1 = arith.constant 0 : i32
    return %c0_i32, %c0_i32_0 : i32, i32
  }
  func.func @transform_7(%arg0: i32) -> (i32, i32) {
    %c0_i32 = arith.constant 0 : i32
    %c0_i32_0 = arith.constant 0 : i32
    return %c0_i32, %arg0 : i32, i32
  }
}

</mosaic_0001>

<bundles_post_ra>
// kernel: feedforward_actor.1
= control target key start
LH: loop header
LB: loop body
LE: loop exit
PB: predicated region body
PF: predicated region fallthrough
CT: control target
= control target key end

     0   :  { %vm140_vm0 = vcmask 130048   ;;  %v864_v2 = vmov 0   ;;  %vm866_vm1 = vmmov 0   ;;  %vm695_vm2 = vcmask 64512   ;;  %s1114_s0 = inlined_call_operand.vmem [shape: f32[8,16], index: 0, kind: input, shape index: {}]   ;;  %s1115_s1 = inlined_call_operand.vmem [shape: f32[128,16], index: 1, kind: input, shape index: {}]   ;;  %s1116_s2 = inlined_call_operand.vmem [shape: f32[128,1], index: 2, kind: input, shape index: {}]   ;;  %s1117_s4 = inlined_call_operand.vmem [shape: f32[128,1], index: 4, kind: input, shape index: {}]   ;;  %s1118_s6 = inlined_call_operand.vmem [shape: f32[8,1], index: 6, kind: input, shape index: {}]   ;;  %s1119_s3 = inlined_call_operand.vmem [shape: bf16[128,128], index: 3, kind: input, shape index: {}]   ;;  %s1120_s5 = inlined_call_operand.vmem [shape: bf16[8,128], index: 5, kind: input, shape index: {}]   ;;  %s1121_s7 = inlined_call_operand.vmem [shape: f32[8,8], index: 7, kind: output, shape index: {}]  }
   0x1   :  { %v43_v0 = vld [vmem:[%s1114_s0] sm:$0xff]  ;;  %850 = vset.pattern.permute.xlu0 %v864_v2  ;;  %851 = vset.pattern.permute.xlu1 %v864_v2  ;;  %v28_v3 = vld [vmem:[%s1115_s1 + $0x8] sm:$0xff]  ;;  %v29_v4 = vld [vmem:[%s1115_s1 + $0x10] sm:$0xff] }
   0x2   :  { %v27_v1 = vld [vmem:[%s1115_s1] sm:$0xff]  ;;  %769 = vmatprep.subr.msk.mxu0 %vm140_vm0, %v43_v0  ;;  %v45_v6 = vld [vmem:[%s1116_s2 + $0x8] sm:$0xff]  ;;  %v46_v7 = vld [vmem:[%s1116_s2 + $0x10] sm:$0xff] }
   0x3   :  { %771 = vmatprep.mubr.msk.f32.mxu0 %vm140_vm0, %v27_v1  ;;  %770 = vmatpush3.xpose.msk.msra.mxu0 %vm140_vm0, %v43_v0  ;;  %v44_v5 = vld [vmem:[%s1116_s2] sm:$0xff]  ;;  %v30_v8 = vld [vmem:[%s1115_s1 + $0x18] sm:$0xff]  ;;  %v32_v12 = vld [vmem:[%s1115_s1 + $0x28] sm:$0xff] }
   0x4   :  { %62 = vperm.xlu0 %850, %v44_v5   ;;  %72 = vperm.xlu1 %851, %v46_v7   ;;  %v31_v9 = vld [vmem:[%s1115_s1 + $0x20] sm:$0xff]  ;;  %v47_v10 = vld [vmem:[%s1116_s2 + $0x18] sm:$0xff]  ;;  %v33_v13 = vld [vmem:[%s1115_s1 + $0x30] sm:$0xff] }
   0x5   :  { %v48_v11 = vld [vmem:[%s1116_s2 + $0x20] sm:$0xff]  ;;  %v49_v14 = vld [vmem:[%s1116_s2 + $0x28] sm:$0xff]  ;;  %v50_v15 = vld [vmem:[%s1116_s2 + $0x30] sm:$0xff] }
   0x6   :  { %772 = vmatmul.mubr.msk.f32.vlgmr.msra.gmra.mrb[0].mxu0 %vm140_vm0, %v28_v3  ;;  %v34_v16 = vld [vmem:[%s1115_s1 + $0x38] sm:$0xff]  ;;  %v35_v17 = vld [vmem:[%s1115_s1 + $0x40] sm:$0xff]  ;;  %v36_v20 = vld [vmem:[%s1115_s1 + $0x48] sm:$0xff] }
   0x7   :  { %774 = vmatprep.mubr.msk.f32.mxu0 %vm140_vm0, %v29_v4  ;;  %v51_v18 = vld [vmem:[%s1116_s2 + $0x38] sm:$0xff]  ;;  %v52_v19 = vld [vmem:[%s1116_s2 + $0x40] sm:$0xff]  ;;  %v37_v21 = vld [vmem:[%s1115_s1 + $0x50] sm:$0xff] }
   0x8   :  { %67 = vperm.xlu0 %850, %v45_v6   ;;  %77 = vperm.xlu1 %851, %v47_v10   ;;  %v53_v22 = vld [vmem:[%s1116_s2 + $0x48] sm:$0xff]  ;;  %v54_v23 = vld [vmem:[%s1116_s2 + $0x50] sm:$0xff]  ;;  %v38_v24 = vld [vmem:[%s1115_s1 + $0x58] sm:$0xff] }
   0x9   :  { %v39_v25 = vld [vmem:[%s1115_s1 + $0x60] sm:$0xff]  ;;  %v55_v26 = vld [vmem:[%s1116_s2 + $0x58] sm:$0xff]  ;;  %v40_v28 = vld [vmem:[%s1115_s1 + $0x68] sm:$0xff] }
   0xa   :  { %775 = vmatmul.mubr.msk.f32.gmra.mrb[2].mxu0 %vm140_vm0, %v30_v8  ;;  %v56_v27 = vld [vmem:[%s1116_s2 + $0x60] sm:$0xff]  ;;  %v41_v29 = vld [vmem:[%s1115_s1 + $0x70] sm:$0xff]  ;;  %v57_v30 = vld [vmem:[%s1116_s2 + $0x68] sm:$0xff] }
   0xb   :  { %777 = vmatprep.mubr.msk.f32.mxu0 %vm140_vm0, %v31_v9  ;;  %v58_v31 = vld [vmem:[%s1116_s2 + $0x70] sm:$0xff]  ;;  %v42_v32 = vld [vmem:[%s1115_s1 + $0x78] sm:$0xff]  ;;  %v377_v34 = vld [vmem:[%s1117_s4] sm:$0xff] }
   0xc   :  { %82 = vperm.xlu0 %850, %v48_v11   ;;  %87 = vperm.xlu1 %851, %v49_v14   ;;  %v59_v33 = vld [vmem:[%s1116_s2 + $0x78] sm:$0xff]  ;;  %v378_v35 = vld [vmem:[%s1117_s4 + $0x8] sm:$0xff]  ;;  %v379_v36 = vld [vmem:[%s1117_s4 + $0x10] sm:$0xff] }
   0xd   :  { %v380_v37 = vld [vmem:[%s1117_s4 + $0x18] sm:$0xff]  ;;  %v381_v38 = vld [vmem:[%s1117_s4 + $0x20] sm:$0xff]  ;;  %v382_v39 = vld [vmem:[%s1117_s4 + $0x28] sm:$0xff] }
   0xe   :  { %778 = vmatmul.mubr.msk.f32.gmra.mrb[4].mxu0 %vm140_vm0, %v32_v12  ;;  %v383_v40 = vld [vmem:[%s1117_s4 + $0x30] sm:$0xff]  ;;  %v384_v41 = vld [vmem:[%s1117_s4 + $0x38] sm:$0xff]  ;;  %v385_v42 = vld [vmem:[%s1117_s4 + $0x40] sm:$0xff] }
   0xf   :  { %780 = vmatprep.mubr.msk.f32.mxu0 %vm140_vm0, %v33_v13  ;;  %v386_v43 = vld [vmem:[%s1117_s4 + $0x48] sm:$0xff]  ;;  %v387_v44 = vld [vmem:[%s1117_s4 + $0x50] sm:$0xff]  ;;  %v388_v45 = vld [vmem:[%s1117_s4 + $0x58] sm:$0xff] }
  0x10   :  { %92 = vperm.xlu0 %850, %v50_v15   ;;  %97 = vperm.xlu1 %851, %v51_v18   ;;  %v389_v46 = vld [vmem:[%s1117_s4 + $0x60] sm:$0xff]  ;;  %v390_v47 = vld [vmem:[%s1117_s4 + $0x68] sm:$0xff]  ;;  %v391_v48 = vld [vmem:[%s1117_s4 + $0x70] sm:$0xff] }
  0x11   :  { %v392_v49 = vld [vmem:[%s1117_s4 + $0x78] sm:$0xff]  ;;  %v643_v50 = vld [vmem:[%s1118_s6] sm:$0xff] }
  0x12   :  { %781 = vmatmul.mubr.msk.f32.gmra.mrb[6].mxu0 %vm140_vm0, %v34_v16  ;;  %v852_v51 = vld [vmem:[%s1119_s3] sm:$0xff]  }
  0x13   :  { %783 = vmatprep.mubr.msk.f32.mxu0 %vm140_vm0, %v35_v17  ;;  %811 = vmatprep.mubr.bf16.mxu1 %v852_v51 }
  0x14   :  { %102 = vperm.xlu0 %850, %v52_v19   ;;  %107 = vperm.xlu1 %851, %v53_v22  }
  0x16   :  { %784 = vmatmul.mubr.msk.f32.gmra.mrb[8].mxu0 %vm140_vm0, %v36_v20 }
  0x17   :  { %786 = vmatprep.mubr.msk.f32.mxu0 %vm140_vm0, %v37_v21 }
  0x18   :  { %112 = vperm.xlu0 %850, %v54_v23   ;;  %117 = vperm.xlu1 %851, %v55_v26  }
  0x1a   :  { %787 = vmatmul.mubr.msk.f32.gmra.mrb[10].mxu0 %vm140_vm0, %v38_v24 }
  0x1b   :  { %789 = vmatprep.mubr.msk.f32.mxu0 %vm140_vm0, %v39_v25 }
  0x1c   :  { %122 = vperm.xlu0 %850, %v56_v27   ;;  %127 = vperm.xlu1 %851, %v57_v30  }
  0x1e   :  { %790 = vmatmul.mubr.msk.f32.gmra.mrb[12].mxu0 %vm140_vm0, %v40_v28 }
  0x1f   :  { %792 = vmatprep.mubr.msk.f32.mxu0 %vm140_vm0, %v41_v29 }
  0x20   :  { %132 = vperm.xlu0 %850, %v58_v31   ;;  %137 = vperm.xlu1 %851, %v59_v33  }
  0x22   :  { %793 = vmatmul.mubr.msk.f32.gmra.mrb[14].mxu0 %vm140_vm0, %v42_v32 }
  0x24   :  { %395 = vperm.xlu0 %850, %v377_v34   ;;  %400 = vperm.xlu1 %851, %v378_v35  }
  0x28   :  { %405 = vperm.xlu0 %850, %v379_v36   ;;  %410 = vperm.xlu1 %851, %v380_v37  }
  0x2c   :  { %415 = vperm.xlu0 %850, %v381_v38   ;;  %420 = vperm.xlu1 %851, %v382_v39  }
  0x30   :  { %425 = vperm.xlu0 %850, %v383_v40   ;;  %430 = vperm.xlu1 %851, %v384_v41  }
  0x34   :  { %435 = vperm.xlu0 %850, %v385_v42   ;;  %440 = vperm.xlu1 %851, %v386_v43  }
  0x38   :  { %445 = vperm.xlu0 %850, %v387_v44   ;;  %450 = vperm.xlu1 %851, %v388_v45  }
  0x3c   :  { %455 = vperm.xlu0 %850, %v389_v46   ;;  %460 = vperm.xlu1 %851, %v390_v47  }
  0x40   :  { %465 = vperm.xlu0 %850, %v391_v48   ;;  %470 = vperm.xlu1 %851, %v392_v49  }
  0x44   :  { %646 = vperm.xlu0 %850, %v643_v50  }
  0x83   :  { %v73_v52 = vpop.permute.xlu1 %72  ;;  %v63_v53 = vpop.permute.xlu0 %62 }
  0x87   :  { %v78_v54 = vpop.permute.xlu1 %77  ;;  %v68_v55 = vpop.permute.xlu0 %67 }
  0x8b   :  { %v88_v56 = vpop.permute.xlu1 %87  ;;  %v83_v57 = vpop.permute.xlu0 %82 }
  0x8f   :  { %v98_v63 = vpop.permute.xlu1 %97  ;;  %v93_v2 = vpop.permute.xlu0 %92 }
  0x93   :  { %v108_v12 = vpop.permute.xlu1 %107  ;;  %v103_v15 = vpop.permute.xlu0 %102 }
  0x97   :  { %v118_v24 = vpop.permute.xlu1 %117  ;;  %v113_v27 = vpop.permute.xlu0 %112 }
  0x9b   :  { %v128_v37 = vpop.permute.xlu1 %127  ;;  %v123_v40 = vpop.permute.xlu0 %122 }
  0x9f   :  { %v138_v49 = vpop.permute.xlu1 %137 }
  0xd9   :  { %v773_v58 = vpop.f32.mrb[0].mxu0 }
  0xda   :  { %v264_v59 = vadd.f32 %v773_v58, %v68_v55  ;;  %v258_v60 = vpop.f32.mrb[1].mxu0 }
  0xdb   :  { %v259_v61 = vadd.f32 %v258_v60, %v63_v53  ;;  %v853_v60 = vld [vmem:[%s1119_s3 + $0x8] sm:$0xff]  }
  0xdc   :  { %v338_v62 = vmax.f32 %v264_v59, 0.0 }
  0xdd   :  { %v337_v0 = vmax.f32 %v259_v61, 0.0  ;;  %v776_v1 = vpop.f32.mrb[2].mxu0  ;;  %v854_v61 = vld [vmem:[%s1119_s3 + $0x10] sm:$0xff]  }
  0xde   :  { %v274_v3 = vadd.f32 %v776_v1, %v78_v54  ;;  %v268_v4 = vpop.f32.mrb[3].mxu0  ;;  %v858_v1 = vld [vmem:[%s1119_s3 + $0x30] sm:$0xff]  }
  0xdf   :  { %v269_v5 = vadd.f32 %v268_v4, %v73_v52  ;;  %v369_v6 = vpack.c.bf16 %v338_v62, %v337_v0  ;;  %v133_v52 = vpop.permute.xlu0 %132  ;;  %v855_v62 = vld [vmem:[%s1119_s3 + $0x18] sm:$0xff]   ;;  %v857_v0 = vld [vmem:[%s1119_s3 + $0x28] sm:$0xff]  }
  0xe0   :  { %v340_v7 = vmax.f32 %v274_v3, 0.0  ;;  %v865_v3 = vmov 0.0  }
  0xe1   :  { %v339_v8 = vmax.f32 %v269_v5, 0.0  ;;  %v779_v9 = vpop.f32.mrb[4].mxu0  ;;  %795 = vmatprep.subr.bf16.mxu1 %v369_v6  ;;  %827 = vmatprep.subr.bf16.mxu0 %v865_v3  ;;  %v401_v5 = vpop.permute.xlu1 %400 }
  0xe2   :  { %v284_v10 = vadd.f32 %v779_v9, %v88_v56  ;;  %v278_v11 = vpop.f32.mrb[5].mxu0  ;;  %796 = vmatpush3.bf16.msra.mxu1 %v369_v6  ;;  %843 = vmatprep.mubr.msk.bf16.mxu0 %vm866_vm1, %v865_v3 }
  0xe3   :  { %v370_v13 = vpack.c.bf16 %v340_v7, %v339_v8  ;;  %v279_v14 = vadd.f32 %v278_v11, %v83_v57  ;;  %v396_v4 = vpop.permute.xlu0 %395 }
  0xe4   :  { %v342_v16 = vmax.f32 %v284_v10, 0.0 }
  0xe5   :  { %v341_v17 = vmax.f32 %v279_v14, 0.0  ;;  %v782_v18 = vpop.f32.mrb[6].mxu0  ;;  %797 = vmatprep.subr.bf16.mxu1 %v370_v13  ;;  %v411_v7 = vpop.permute.xlu1 %410 }
  0xe6   :  { %v294_v19 = vadd.f32 %v782_v18, %v98_v63  ;;  %v288_v20 = vpop.f32.mrb[7].mxu0  ;;  %798 = vmatpush3.bf16.msra.mxu1 %v370_v13  ;;  %v856_v63 = vld [vmem:[%s1119_s3 + $0x20] sm:$0xff]  }
  0xe7   :  { %v371_v21 = vpack.c.bf16 %v342_v16, %v341_v17  ;;  %v289_v22 = vadd.f32 %v288_v20, %v93_v2  ;;  %v859_v2 = vld [vmem:[%s1119_s3 + $0x38] sm:$0xff]   ;;  %v406_v6 = vpop.permute.xlu0 %405 }
  0xe8   :  { %v344_v23 = vmax.f32 %v294_v19, 0.0 }
  0xe9   :  { %v343_v25 = vmax.f32 %v289_v22, 0.0  ;;  %v785_v26 = vpop.f32.mrb[8].mxu0  ;;  %799 = vmatprep.subr.bf16.mxu1 %v371_v21  ;;  %v421_v9 = vpop.permute.xlu1 %420 }
  0xea   :  { %v304_v28 = vadd.f32 %v785_v26, %v108_v12  ;;  %v298_v29 = vpop.f32.mrb[9].mxu0  ;;  %800 = vmatpush3.bf16.msra.mxu1 %v371_v21 }
  0xeb   :  { %v372_v30 = vpack.c.bf16 %v344_v23, %v343_v25  ;;  %v299_v31 = vadd.f32 %v298_v29, %v103_v15  ;;  %v416_v8 = vpop.permute.xlu0 %415 }
  0xec   :  { %v346_v32 = vmax.f32 %v304_v28, 0.0 }
  0xed   :  { %v345_v33 = vmax.f32 %v299_v31, 0.0  ;;  %v788_v34 = vpop.f32.mrb[10].mxu0  ;;  %801 = vmatprep.subr.bf16.mxu1 %v372_v30  ;;  %v431_v14 = vpop.permute.xlu1 %430 }
  0xee   :  { %v314_v35 = vadd.f32 %v788_v34, %v118_v24  ;;  %v308_v36 = vpop.f32.mrb[11].mxu0  ;;  %802 = vmatpush3.bf16.msra.mxu1 %v372_v30 }
  0xef   :  { %v373_v38 = vpack.c.bf16 %v346_v32, %v345_v33  ;;  %v309_v39 = vadd.f32 %v308_v36, %v113_v27  ;;  %v426_v10 = vpop.permute.xlu0 %425 }
  0xf0   :  { %v348_v41 = vmax.f32 %v314_v35, 0.0 }
  0xf1   :  { %v347_v42 = vmax.f32 %v309_v39, 0.0  ;;  %v791_v43 = vpop.f32.mrb[12].mxu0  ;;  %803 = vmatprep.subr.bf16.mxu1 %v373_v38  ;;  %v441_v26 = vpop.permute.xlu1 %440 }
  0xf2   :  { %v324_v44 = vadd.f32 %v791_v43, %v128_v37  ;;  %v318_v45 = vpop.f32.mrb[13].mxu0  ;;  %804 = vmatpush3.bf16.msra.mxu1 %v373_v38 }
  0xf3   :  { %v374_v46 = vpack.c.bf16 %v348_v41, %v347_v42  ;;  %v319_v47 = vadd.f32 %v318_v45, %v123_v40  ;;  %v436_v22 = vpop.permute.xlu0 %435 }
  0xf4   :  { %v350_v48 = vmax.f32 %v324_v44, 0.0 }
  0xf5   :  { %v349_v50 = vmax.f32 %v319_v47, 0.0  ;;  %v794_v51 = vpop.f32.mrb[14].mxu0  ;;  %805 = vmatprep.subr.bf16.mxu1 %v374_v46  ;;  %v451_v39 = vpop.permute.xlu1 %450 }
  0xf6   :  { %v334_v53 = vadd.f32 %v794_v51, %v138_v49  ;;  %v328_v54 = vpop.f32.mrb[15].mxu0  ;;  %806 = vmatpush3.bf16.msra.mxu1 %v374_v46 }
  0xf7   :  { %v375_v55 = vpack.c.bf16 %v350_v48, %v349_v50  ;;  %v329_v56 = vadd.f32 %v328_v54, %v133_v52  ;;  %v446_v35 = vpop.permute.xlu0 %445 }
  0xf8   :  { %v352_v57 = vmax.f32 %v334_v53, 0.0 }
  0xf9   :  { %v351_v58 = vmax.f32 %v329_v56, 0.0  ;;  %807 = vmatprep.subr.bf16.mxu1 %v375_v55  ;;  %v461_v52 = vpop.permute.xlu1 %460 }
  0xfa   :  { %808 = vmatpush3.bf16.msra.mxu1 %v375_v55 }
  0xfb   :  { %v376_v59 = vpack.c.bf16 %v352_v57, %v351_v58  ;;  %v456_v47 = vpop.permute.xlu0 %455 }
  0xfd   :  { %809 = vmatprep.subr.bf16.mxu1 %v376_v59 }
  0xfe   :  { %810 = vmatpush3.bf16.msra.mxu1 %v376_v59 }
  0xff   :  { %v466_v59 = vpop.permute.xlu0 %465 }
 0x101   :  { %812 = vmatmul.mubr.bf16.vlgmr.msra.gmra.mrb[0].mxu1 %v853_v60 }
 0x102   :  { %815 = vmatprep.mubr.bf16.mxu1 %v854_v61 }
 0x109   :  { %816 = vmatmul.mubr.bf16.gmra.mrb[4].mxu1 %v855_v62 }
 0x10a   :  { %819 = vmatprep.mubr.bf16.mxu1 %v856_v63 }
 0x111   :  { %820 = vmatmul.mubr.bf16.gmra.mrb[8].mxu1 %v857_v0  ;;  %v471_v0 = vpop.permute.xlu1 %470 }
 0x112   :  { %823 = vmatprep.mubr.bf16.mxu1 %v858_v1 }
 0x119   :  { %824 = vmatmul.mubr.bf16.gmra.mrb[12].mxu1 %v859_v2 }
 0x1d4   :  { %v813_v11 = vpop.f32.mrb[0].mxu1 }
 0x1d5   :  { %v564_v12 = vadd.f32 %v813_v11, %v406_v6  ;;  %v555_v13 = vpop.f32.mrb[1].mxu1 }
 0x1d6   :  { %v556_v15 = vadd.f32 %v555_v13, %v396_v4  ;;  %v814_v16 = vpop.f32.mrb[2].mxu1  ;;  %v634_v13 = vld [vmem:[%s1120_s5] sm:$0xf] }
 0x1d7   :  { %v567_v17 = vadd.f32 %v814_v16, %v411_v7  ;;  %v558_v18 = vpop.f32.mrb[3].mxu1  ;;  %v620_v20 = vmax.f32 %v564_v12, 0.0 }
 0x1d8   :  { %v559_v19 = vadd.f32 %v558_v18, %v401_v5  ;;  %v618_v23 = vmax.f32 %v556_v15, 0.0 }
 0x1d9   :  { %v621_v21 = vmax.f32 %v567_v17, 0.0 }
 0x1da   :  { %v619_v24 = vmax.f32 %v559_v19, 0.0 }
 0x1db   :  { %v636_v25 = vpack.c.bf16 %v621_v21, %v620_v20 }
 0x1dc   :  { %v635_v27 = vpack.c.bf16 %v619_v24, %v618_v23  ;;  %v817_v28 = vpop.f32.mrb[4].mxu1 }
 0x1dd   :  { %v580_v29 = vadd.f32 %v817_v28, %v426_v10  ;;  %v571_v30 = vpop.f32.mrb[5].mxu1 }
 0x1de   :  { %v572_v31 = vadd.f32 %v571_v30, %v416_v8  ;;  %v818_v32 = vpop.f32.mrb[6].mxu1  ;;  %828 = vmatpush3.bf16.msra.mxu0 %v635_v27 }
 0x1df   :  { %v583_v33 = vadd.f32 %v818_v32, %v431_v14  ;;  %v574_v34 = vpop.f32.mrb[7].mxu1  ;;  %829 = vmatprep.subr.bf16.mxu0 %v865_v3  ;;  %v624_v37 = vmax.f32 %v580_v29, 0.0  ;;  %v647_v14 = vpop.permute.xlu0 %646 }
 0x1e0   :  { %v575_v36 = vadd.f32 %v574_v34, %v421_v9  ;;  %v622_v40 = vmax.f32 %v572_v31, 0.0 }
 0x1e1   :  { %v625_v38 = vmax.f32 %v583_v33, 0.0 }
 0x1e2   :  { %v623_v41 = vmax.f32 %v575_v36, 0.0  ;;  %830 = vmatpush3.bf16.msra.mxu0 %v636_v25 }
 0x1e3   :  { %v638_v42 = vpack.c.bf16 %v625_v38, %v624_v37  ;;  %831 = vmatprep.subr.bf16.mxu0 %v865_v3 }
 0x1e4   :  { %v637_v43 = vpack.c.bf16 %v623_v41, %v622_v40  ;;  %v821_v44 = vpop.f32.mrb[8].mxu1 }
 0x1e5   :  { %v596_v45 = vadd.f32 %v821_v44, %v446_v35  ;;  %v587_v46 = vpop.f32.mrb[9].mxu1 }
 0x1e6   :  { %v588_v48 = vadd.f32 %v587_v46, %v436_v22  ;;  %v822_v49 = vpop.f32.mrb[10].mxu1  ;;  %832 = vmatpush3.bf16.msra.mxu0 %v637_v43 }
 0x1e7   :  { %v599_v50 = vadd.f32 %v822_v49, %v451_v39  ;;  %v590_v51 = vpop.f32.mrb[11].mxu1  ;;  %833 = vmatprep.subr.bf16.mxu0 %v865_v3  ;;  %v628_v54 = vmax.f32 %v596_v45, 0.0 }
 0x1e8   :  { %v591_v53 = vadd.f32 %v590_v51, %v441_v26  ;;  %v626_v56 = vmax.f32 %v588_v48, 0.0 }
 0x1e9   :  { %v629_v55 = vmax.f32 %v599_v50, 0.0 }
 0x1ea   :  { %v627_v57 = vmax.f32 %v591_v53, 0.0  ;;  %834 = vmatpush3.bf16.msra.mxu0 %v638_v42 }
 0x1eb   :  { %v640_v58 = vpack.c.bf16 %v629_v55, %v628_v54  ;;  %835 = vmatprep.subr.bf16.mxu0 %v865_v3 }
 0x1ec   :  { %v639_v60 = vpack.c.bf16 %v627_v57, %v626_v56  ;;  %v825_v61 = vpop.f32.mrb[12].mxu1 }
 0x1ed   :  { %v612_v62 = vadd.f32 %v825_v61, %v466_v59  ;;  %v603_v63 = vpop.f32.mrb[13].mxu1 }
 0x1ee   :  { %v604_v1 = vadd.f32 %v603_v63, %v456_v47  ;;  %v826_v2 = vpop.f32.mrb[14].mxu1  ;;  %836 = vmatpush3.bf16.msra.mxu0 %v639_v60 }
 0x1ef   :  { %v615_v4 = vadd.f32 %v826_v2, %v471_v0  ;;  %v606_v5 = vpop.f32.mrb[15].mxu1  ;;  %837 = vmatprep.subr.bf16.mxu0 %v865_v3  ;;  %v632_v7 = vmax.f32 %v612_v62, 0.0 }
 0x1f0   :  { %v607_v6 = vadd.f32 %v606_v5, %v461_v52  ;;  %v630_v9 = vmax.f32 %v604_v1, 0.0 }
 0x1f1   :  { %v633_v8 = vmax.f32 %v615_v4, 0.0 }
 0x1f2   :  { %v631_v10 = vmax.f32 %v607_v6, 0.0  ;;  %838 = vmatpush3.bf16.msra.mxu0 %v640_v58 }
 0x1f3   :  { %v642_v11 = vpack.c.bf16 %v633_v8, %v632_v7  ;;  %839 = vmatprep.subr.bf16.mxu0 %v865_v3 }
 0x1f4   :  { %v641_v12 = vpack.c.bf16 %v631_v10, %v630_v9 }
 0x1f6   :  { %840 = vmatpush3.bf16.msra.mxu0 %v641_v12 }
 0x1f7   :  { %841 = vmatprep.subr.bf16.mxu0 %v865_v3 }
 0x1fa   :  { %842 = vmatpush3.bf16.msra.mxu0 %v642_v11 }
 0x1fd   :  { %844 = vmatmul.mubr.bf16.vlgmr.msra.gmra.mrb[16].mxu0 %v634_v13 }
 0x2d0   :  { %v683_v15 = vpop.f32.mrb[16].mxu0 }
 0x2d1   :  { %v684_v16 = vadd.f32 %v683_v15, %v647_v14  ;;  %v845_v17 = vpop.f32.mrb[17].mxu0 }
 0x2d2   :  { %v686_v18 = vpop.f32.mrb[18].mxu0 }
 0x2d3   :  { %v726_v19 = vmul.f32 -1.442695, %v684_v16  ;;  %v846_v20 = vpop.f32.mrb[19].mxu0 }
 0x2d5   :  { %860 = vpow2.f32 %v726_v19 }
 0x2df   :  { %v861_v21 = vpop.eup %860 }
 0x2e0   :  { %v692_v22 = vadd.f32 1.0, %v861_v21 }
 0x2e2   :  { %862 = vrcp.f32 %v692_v22 }
 0x2ec   :  { %v863_v23 = vpop.eup %862 }
 0x2ed   :  { %696 = vst.msk [vmem:[%s1121_s7] sm:$0xff] %vm695_vm2, %v863_v23 }

</bundles_post_ra>
